<compile_context>
chip_gen: v6e
topology: v6e:2x2x1
jax: 0.10.0
libtpu: 0.0.40
codegen_flags: <defaults>
</compile_context>

<pallas_src>
import functools

import jax
import jax.numpy as jnp
from jax.experimental import pallas as pl
from jax.experimental.pallas import tpu as pltpu


# --------------------------------------------------------------------------
# Kernel: per spatial position (lane column), LayerNorm over channels.
#   x_ref: (1, C, T)   w_ref/b_ref: (C, Lw)   o_ref: (1, C, T)
# --------------------------------------------------------------------------
def _layernorm_kernel(x_ref, w_ref, *rest, with_bias, eps, lane_reps):
    if with_bias:
        b_ref, o_ref = rest
    else:
        (o_ref,) = rest

    x = x_ref[0].astype(jnp.float32)                       # (C, T)
    c = x.shape[0]
    inv_c = jnp.float32(1.0 / c)

    # Single pass over x for the statistics (f32 accumulation).
    s1 = jnp.sum(x, axis=0, keepdims=True)                 # (1, T)
    s2 = jnp.sum(x * x, axis=0, keepdims=True)             # (1, T)
    mu = s1 * inv_c
    # maximum() guards tiny negative rounding of E[x^2]-mu^2, and garbage in the
    # padded lanes of a partial last tile (those lanes are dropped by the masked
    # store, but this keeps the math well-defined).
    var = jnp.maximum(s2 * inv_c - mu * mu, 0.0)
    inv = jax.lax.rsqrt(var + eps)                         # EUP rsqrt, no divide

    def expand(p_ref):
        p = p_ref[...].astype(jnp.float32)                 # (C, Lw)
        if lane_reps > 1:
            # (C, 128) -> (C, T) via 128-aligned vreg copies (no lane broadcast).
            p = jnp.tile(p, (1, lane_reps))
        return p

    w = expand(w_ref)
    if with_bias:
        y = (x - mu) * inv * w + expand(b_ref)
    else:
        # BiasFree: output uses the *uncentered* x (matches the PyTorch module);
        # the centered tensor is never materialized.
        y = x * inv * w
    o_ref[0] = y.astype(o_ref.dtype)


def restormer_layernorm(x, weight, bias=None, *, eps=1e-5,
                        target_tile_bytes=3 * 1024 * 1024, max_lanes=8192):
    """Restormer LayerNorm on an NCHW tensor. bias=None -> BiasFree variant."""
    B, C, H, W = x.shape
    HW = H * W
    x_flat = x.reshape(B, C, HW)
    itemsize = jnp.dtype(x.dtype).itemsize

    # ---- adaptive, lane-dense tiling of the spatial axis ------------------
    t0 = (target_tile_bytes // (C * itemsize)) // 128 * 128
    T = int(min(max(t0, 128), max_lanes))
    if HW <= T:
        T = HW                                  # full extent (block == full array dim)
    else:
        # keep at least ~4 grid steps so v7x's two TensorCores both stay busy
        while T > 128 and B * (-(-HW // T)) < 4:
            T = max(128, (T // 2) // 128 * 128)
    grid = (B, pl.cdiv(HW, T))

    # ---- affine params as a lane-dense, VMEM-resident (C, Lw) slab --------
    if T % 128 == 0:
        Lw, lane_reps = 128, T // 128
    else:
        Lw, lane_reps = T, 1                    # small non-128-multiple spatial extents
    with_bias = bias is not None

    args = [x_flat, jnp.broadcast_to(weight.reshape(C, 1), (C, Lw))]
    in_specs = [
        pl.BlockSpec((1, C, T), lambda bi, ti: (bi, 0, ti)),
        pl.BlockSpec((C, Lw), lambda bi, ti: (0, 0)),       # stays VMEM-resident
    ]
    if with_bias:
        args.append(jnp.broadcast_to(bias.reshape(C, 1), (C, Lw)))
        in_specs.append(pl.BlockSpec((C, Lw), lambda bi, ti: (0, 0)))

    # ---- VMEM budget: double-buffered tiles + params + f32 temporaries ----
    tile_bytes = C * T * itemsize
    param_bytes = C * Lw * jnp.dtype(weight.dtype).itemsize * (2 if with_bias else 1)
    temps_bytes = 4 * C * T * 4                 # x, x*x, tiled params, y (f32 upper bound)
    needed = 4 * tile_bytes + 2 * param_bytes + temps_bytes
    vmem_limit = int(min(max(needed + needed // 4, 32 * 1024 * 1024),
                         56 * 1024 * 1024))     # stay under v7x's 64 MiB physical VMEM

    kern = functools.partial(_layernorm_kernel, with_bias=with_bias, eps=eps,
                             lane_reps=lane_reps)
    out = pl.pallas_call(
        kern,
        out_shape=jax.ShapeDtypeStruct((B, C, HW), x.dtype),
        grid=grid,
        in_specs=in_specs,
        out_specs=pl.BlockSpec((1, C, T), lambda bi, ti: (bi, 0, ti)),
        compiler_params=pltpu.CompilerParams(
            dimension_semantics=("parallel", "parallel"),
            vmem_limit_bytes=vmem_limit,
        ),
    )(*args)
    return out.reshape(B, C, H, W)


# --------------------------------------------------------------------------
# Pure-JAX reference (matches the PyTorch module semantics)
# --------------------------------------------------------------------------
def reference(x, weight, bias=None, eps=1e-5):
    mu = jnp.mean(x, axis=1, keepdims=True)
    var = jnp.mean((x - mu) ** 2, axis=1, keepdims=True)
    inv = 1.0 / jnp.sqrt(var + eps)
    w = weight[None, :, None, None]
    if bias is not None:
        return (x - mu) * inv * w + bias[None, :, None, None]
    return x * inv * w


if __name__ == "__main__":
    key = jax.random.PRNGKey(0)
    kx, kw, kb, kx2 = jax.random.split(key, 4)

    # ---- primary small test (module-consistent shapes) --------------------
    B, C, H, W = 2, 4, 16, 16
    x = jax.random.normal(kx, (B, C, H, W), jnp.float32)
    # Non-trivial affine params so the test is meaningful (module inits 1/0).
    weight = 1.0 + 0.1 * jax.random.normal(kw, (C,), jnp.float32)
    bias = 0.1 * jax.random.normal(kb, (C,), jnp.float32)

    out_wb = jax.block_until_ready(restormer_layernorm(x, weight, bias))
    ref_wb = jax.block_until_ready(reference(x, weight, bias))
    assert out_wb.shape == (B, C, H, W)
    assert jnp.allclose(out_wb, ref_wb, rtol=1e-4, atol=1e-4), (
        f"WithBias max abs err {jnp.max(jnp.abs(out_wb - ref_wb))}")

    out_bf = jax.block_until_ready(restormer_layernorm(x, weight, None))
    ref_bf = jax.block_until_ready(reference(x, weight, None))
    assert jnp.allclose(out_bf, ref_bf, rtol=1e-4, atol=1e-4), (
        f"BiasFree max abs err {jnp.max(jnp.abs(out_bf - ref_bf))}")

    # ---- exercise the multi-tile path with a partial (masked) last tile ---
    C2, H2, W2 = 8, 16, 20                      # HW = 320 -> tiles of 128 + partial
    x2 = jax.random.normal(kx2, (1, C2, H2, W2), jnp.float32)
    w2 = 1.0 + 0.1 * jax.random.normal(kw, (C2,), jnp.float32)
    b2 = 0.1 * jax.random.normal(kb, (C2,), jnp.float32)
    out2 = jax.block_until_ready(restormer_layernorm(x2, w2, b2, max_lanes=128))
    ref2 = jax.block_until_ready(reference(x2, w2, b2))
    assert jnp.allclose(out2, ref2, rtol=1e-4, atol=1e-4), (
        f"Tiled WithBias max abs err {jnp.max(jnp.abs(out2 - ref2))}")

    print("KERNEL_OK")
</pallas_src>

<mosaic_0001>
module attributes {stable_mosaic.version = 11 : i64} {
  func.func @_layernorm_kernel(%arg0: i32, %arg1: i32, %arg2: memref<1x4x256xf32, #tpu.memory_space<vmem>>, %arg3: memref<4x128xf32, #tpu.memory_space<vmem>>, %arg4: memref<4x128xf32, #tpu.memory_space<vmem>>, %arg5: memref<1x4x256xf32, #tpu.memory_space<vmem>>) attributes {dimension_semantics = [#tpu.dimension_semantics<parallel>, #tpu.dimension_semantics<parallel>], iteration_bounds = array<i64: 2, 1>, scalar_prefetch = 0 : i64, scratch_operands = 0 : i64, tpu.core_type = #tpu.core_type<tc>, window_params = [{transform_indices = @transform_0, window_bounds = array<i64: 1, 4, 256>}, {pipeline_mode = #tpu.pipeline_mode<synchronous>, transform_indices = @transform_1, window_bounds = array<i64: 4, 128>}, {pipeline_mode = #tpu.pipeline_mode<synchronous>, transform_indices = @transform_2, window_bounds = array<i64: 4, 128>}, {transform_indices = @transform_3, window_bounds = array<i64: 1, 4, 256>}]} {
    %c0 = arith.constant 0 : index
    %c0_0 = arith.constant 0 : index
    %c0_1 = arith.constant 0 : index
    %0 = vector.load %arg2[%c0, %c0_0, %c0_1] : memref<1x4x256xf32, #tpu.memory_space<vmem>>, vector<1x4x256xf32>
    %1 = vector.shape_cast %0 : vector<1x4x256xf32> to vector<4x256xf32>
    %cst = arith.constant dense<0.000000e+00> : vector<256xf32>
    %2 = vector.multi_reduction <add>, %1, %cst [0] : vector<4x256xf32> to vector<256xf32>
    %3 = vector.shape_cast %2 : vector<256xf32> to vector<1x256xf32>
    %4 = arith.mulf %1, %1 : vector<4x256xf32>
    %cst_2 = arith.constant dense<0.000000e+00> : vector<256xf32>
    %5 = vector.multi_reduction <add>, %4, %cst_2 [0] : vector<4x256xf32> to vector<256xf32>
    %6 = vector.shape_cast %5 : vector<256xf32> to vector<1x256xf32>
    %cst_3 = arith.constant 2.500000e-01 : f32
    %7 = vector.broadcast %cst_3 : f32 to vector<1x256xf32>
    %8 = arith.mulf %3, %7 : vector<1x256xf32>
    %cst_4 = arith.constant 2.500000e-01 : f32
    %9 = vector.broadcast %cst_4 : f32 to vector<1x256xf32>
    %10 = arith.mulf %6, %9 : vector<1x256xf32>
    %11 = arith.mulf %8, %8 : vector<1x256xf32>
    %12 = arith.subf %10, %11 : vector<1x256xf32>
    %cst_5 = arith.constant 0.000000e+00 : f32
    %13 = vector.broadcast %cst_5 : f32 to vector<1x256xf32>
    %14 = arith.maximumf %12, %13 : vector<1x256xf32>
    %cst_6 = arith.constant 9.99999974E-6 : f32
    %15 = vector.broadcast %cst_6 : f32 to vector<1x256xf32>
    %16 = arith.addf %14, %15 : vector<1x256xf32>
    %17 = math.rsqrt %16 : vector<1x256xf32>
    %c0_7 = arith.constant 0 : index
    %c0_8 = arith.constant 0 : index
    %18 = vector.load %arg3[%c0_7, %c0_8] : memref<4x128xf32, #tpu.memory_space<vmem>>, vector<4x128xf32>
    %19 = tpu.concatenate %18, %18 in 1 : vector<4x128xf32>, vector<4x128xf32> -> vector<4x256xf32>
    %20 = vector.broadcast %8 : vector<1x256xf32> to vector<4x256xf32>
    %21 = arith.subf %1, %20 : vector<4x256xf32>
    %22 = vector.broadcast %17 : vector<1x256xf32> to vector<4x256xf32>
    %23 = arith.mulf %21, %22 : vector<4x256xf32>
    %24 = arith.mulf %23, %19 : vector<4x256xf32>
    %c0_9 = arith.constant 0 : index
    %c0_10 = arith.constant 0 : index
    %25 = vector.load %arg4[%c0_9, %c0_10] : memref<4x128xf32, #tpu.memory_space<vmem>>, vector<4x128xf32>
    %26 = tpu.concatenate %25, %25 in 1 : vector<4x128xf32>, vector<4x128xf32> -> vector<4x256xf32>
    %27 = arith.addf %24, %26 : vector<4x256xf32>
    %c0_11 = arith.constant 0 : index
    %c0_12 = arith.constant 0 : index
    %c0_13 = arith.constant 0 : index
    %28 = vector.load %arg5[%c0_11, %c0_12, %c0_13] : memref<1x4x256xf32, #tpu.memory_space<vmem>>, vector<1x4x256xf32>
    %29 = vector.shape_cast %28 : vector<1x4x256xf32> to vector<4x256xf32>
    %30 = vector.shape_cast %27 : vector<4x256xf32> to vector<1x4x256xf32>
    tpu.vector_store %arg5[%c0_11, %c0_12, %c0_13], %30 {strides = array<i32>} : memref<1x4x256xf32, #tpu.memory_space<vmem>>, vector<1x4x256xf32>,
    return
  }
  func.func @transform_0(%arg0: i32, %arg1: i32) -> (i32, i32, i32) {
    %c0_i32 = arith.constant 0 : i32
    %c0_i32_0 = arith.constant 0 : i32
    return %arg0, %c0_i32, %arg1 : i32, i32, i32
  }
  func.func @transform_1(%arg0: i32, %arg1: i32) -> (i32, i32) {
    %c0_i32 = arith.constant 0 : i32
    %c0_i32_0 = arith.constant 0 : i32
    %c0_i32_1 = arith.constant 0 : i32
    return %c0_i32, %c0_i32_0 : i32, i32
  }
  func.func @transform_2(%arg0: i32, %arg1: i32) -> (i32, i32) {
    %c0_i32 = arith.constant 0 : i32
    %c0_i32_0 = arith.constant 0 : i32
    %c0_i32_1 = arith.constant 0 : i32
    return %c0_i32, %c0_i32_0 : i32, i32
  }
  func.func @transform_3(%arg0: i32, %arg1: i32) -> (i32, i32, i32) {
    %c0_i32 = arith.constant 0 : i32
    %c0_i32_0 = arith.constant 0 : i32
    return %arg0, %c0_i32, %arg1 : i32, i32, i32
  }
}

</mosaic_0001>

<bundles_post_ra>
// kernel: tpu_custom_call.1
= control target key start
LH: loop header
LB: loop body
LE: loop exit
PB: predicated region body
PF: predicated region fallthrough
CT: control target
= control target key end

     0   :  { %8 = vsyncpa [#allocation3], 0  ;;  %s903_s0 = inlined_call_operand.hbm [shape: f32[2,4,256], index: 0, kind: input, shape index: {}]   ;;  %s904_s1 = inlined_call_operand.hbm [shape: f32[4,128], index: 1, kind: input, shape index: {}]   ;;  %s905_s2 = inlined_call_operand.hbm [shape: f32[4,128], index: 2, kind: input, shape index: {}]   ;;  %s906_s3 = inlined_call_operand.hbm [shape: f32[2,4,256], index: 3, kind: output, shape index: {}]  }
   0x1   :  { %10 = vsyncpa [#allocation3 + $0x1], 0 }
   0x2   :  { %11 = vsyncpa [#allocation6], 0 }
   0x3   :  { %12 = vsyncpa [#allocation4], 0 }
   0x4   :  { %14 = vsyncpa [#allocation4 + $0x1], 0  ;;  %s725_s12 = smov 0   ;;  %s727_s13 = smov 0  }
   0x5   :  { %s729_s14 = smov 0   ;;  %s731_s15 = smov 0  }
   0x6   :  { %s733_s16 = smov 0   ;;  %s735_s17 = smov 0  }
   0x7 LB: > { %s424_s18 = sadd.s32 4294967295, %s699_s17   ;;  %s425_s19 = sadd.s32 4294967294, %s699_s17   ;;  %s699_s17 = sphi %s735_s17, %s20_s17   ;;  %s695_s16 = sphi %s733_s16, %s929_s16   ;;  %s691_s15 = sphi %s731_s15, %s928_s15   ;;  %s687_s14 = sphi %s729_s14, %s927_s14   ;;  %s683_s13 = sphi %s727_s13, %s926_s13   ;;  %s679_s12 = sphi %s725_s12, %s925_s12  }
   0x8   : > { %p54_p0 = scmp.ne.s32.totalorder %s683_s13, %s679_s12  ;;  %p759_p1 = scmp.eq.s32.totalorder %s424_s18, 0 }
   0x9   : > { %p763_p2 = scmp.eq.s32.totalorder %s424_s18, 1  ;;  %p128_p3 = scmp.eq.s32.totalorder %s425_s19, 1 }
   0xa   : > { %s911_s20 = scalar_select %p759_p1, 1, 0 }
   0xb   : > { %s912_s21 = scalar_select %p763_p2, 1, 0 }
   0xc   : > { %p769_p4 = por %p759_p1, %p54_p0  ;;  %p426_p5 = scmp.ge.s32.totalorder %s699_s17, 1 }
   0xd   : > { %p774_p6 = por %p128_p3, %p54_p0  ;;  %p135_p7 = scmp.lt.s32.totalorder %s699_s17, 3 }
   0xe   : > { %s913_s22 = scalar_select %p769_p4, 1, 0 }
   0xf   : > { %s914_s23 = scalar_select %p774_p6, 1, 0 }
  0x10   : > { %p779_p8 = pnand %p426_p5, %p135_p7  ;;  %s701_s25 = smov [#allocation5]  }
  0x11   : > { %s148_s26 = sshll.u32 %s701_s25, 4  ;;  %s702_s27 = smov [#allocation7]   ;;  %s149_s26 = int_to_ptr.vmem [resolvable:$true] %s148_s26 }
  0x12   : > { %s915_s24 = scalar_select %p779_p8, 1, 0 }
  0x13   : > { %p457_p10 = pneg %p779_p8  ;;  %s159_s28 = sshll.u32 %s702_s27, 4  ;;  %s160_s28 = int_to_ptr.vmem [resolvable:$true] %s159_s28 }
  0x14   : > { %s546_s30 = scalar_lea.vmem %s149_s26, 64  ;;  %p554_p5 = scmp.lt.s32.totalorder %s149_s26, %s149_s26 }
  0x15   : > { %p788_p11 = pnand %p457_p10, %p759_p1  ;;  %p547_p13 = scmp.ne.s32.totalorder %s149_s26, %s546_s30 }
  0x16   : > { %p555_p7 = scmp.lt.s32.totalorder %s546_s30, %s546_s30 }
  0x17   : > { %p537_p12 = pneg %p788_p11 }
  0x18   : > { %p556_p9 = por %p555_p7, %p554_p5 }
  0x19   : > { %p549_p0 = pnand %p547_p13, %p537_p12 }
  0x1b   : > { %p550_p3 = pneg %p549_p0 }
  0x1d   : > { %p557_p6 = pnand %p556_p9, %p550_p3 }
  0x1f   : > { %560 = shalt.err (!%p557_p6)
}
  0x20   : > { %460 = dma.hbm_to_vmem [thread:$0]  (!%p788_p11), %s904_s1, 64, %s149_s26, [#allocation6]  }
  0x21   : > { %s572_s6 = scalar_lea.vmem %s160_s28, 64  ;;  %p580_p13 = scmp.lt.s32.totalorder %s160_s28, %s160_s28 }
  0x22   : > { %p573_p10 = scmp.ne.s32.totalorder %s160_s28, %s572_s6  ;;  %p581_p0 = scmp.lt.s32.totalorder %s572_s6, %s572_s6 }
  0x24   : > { %p575_p1 = pnand %p573_p10, %p537_p12  ;;  %p582_p8 = por %p581_p0, %p580_p13 }
  0x26   : > { %p576_p4 = pneg %p575_p1 }
  0x28   : > { %p583_p2 = pnand %p582_p8, %p576_p4 }
  0x2a   : > { %586 = shalt.err (!%p583_p2)
}
  0x2b   : > { %463 = dma.hbm_to_vmem [thread:$0]  (!%p788_p11), %s905_s2, 64, %s160_s28, [#allocation6]  }
  0x2c   : > { %s32_s9 = sadd.s32 1, %s695_s16  ;;  %s41_s10 = sadd.s32 1, %s687_s14 }
  0x2d   : > { %p34_p1 = scmp.ge.s32.totalorder %s32_s9, 2  ;;  %p48_p2 = scmp.ne.s32.totalorder %s687_s14, %s683_s13 }
  0x2e   : > { %p49_p4 = scmp.eq.s32.totalorder %s699_s17, 0  ;;  %p474_p6 = scmp.lt.s32.totalorder %s699_s17, 2 }
  0x2f   : > { %s931_s9 = smov (%p34_p1, %s32_s9), 0  ;;  %p917_p9 = scmp.ne.s32.totalorder %s912_s21, 0 }
  0x30   : > { %p50_p8 = por %p49_p4, %p48_p2  ;;  %s36_s18 = ssub.s32 %s695_s16, %s931_s9 }
  0x31   : > { %p820_p12 = por %p917_p9, %p48_p2  ;;  %s170_s19 = sand.u32 1, %s687_s14  }
  0x32   : > { %p39_p3 = scmp.eq.s32.totalorder %s36_s18, 0  ;;  %s430_s25 = sshll.u32 %s170_s19, 3 }
  0x33   : > { %s443_s26 = sshll.u32 %s695_s16, 7  ;;  %s174_s4 = scalar_lea.vmem [#allocation2], %s430_s25 }
  0x34   : > { %s829_s27 = scalar_select %p39_p3, %s687_s14, %s41_s10  }
  0x35   : > { %s182_s30 = scalar_lea.hbm %s903_s0, %s443_s26  ;;  %s184_s5 = sshll.u32 %s174_s4, 4  ;;  %s185_s5 = int_to_ptr.vmem [resolvable:$true] %s184_s5 }
  0x36   : > { %p836_p11 = pnand %p474_p6, %p50_p8  ;;  %s171_s6 = scalar_lea.sflag [#allocation3], %s170_s19 }
  0x37   : > { %s600_s7 = scalar_lea.vmem %s185_s5, 128  ;;  %s703_s8 = smov [#allocation2]  }
  0x38   : > { %p589_p5 = pneg %p836_p11  ;;  %p601_p7 = scmp.ne.s32.totalorder %s185_s5, %s600_s7 }
  0x39   : > { %s605_s10 = sshll.u32 %s703_s8, 4  ;;  %s606_s10 = int_to_ptr.vmem [resolvable:$false] %s605_s10 }
  0x3a   : > { %p603_p10 = pnand %p601_p7, %p589_p5  ;;  %s607_s18 = scalar_lea.vmem %s606_s10, 256 }
  0x3b   : > { %p608_p0 = scmp.lt.s32.totalorder %s185_s5, %s606_s10  ;;  %p609_p1 = scmp.lt.s32.totalorder %s607_s18, %s600_s7 }
  0x3c   : > { %p604_p13 = pneg %p603_p10 }
  0x3d   : > { %p610_p2 = por %p609_p1, %p608_p0 }
  0x3f   : > { %p611_p4 = pnand %p610_p2, %p604_p13 }
  0x41   : > { %614 = shalt.err (!%p611_p4)
}
  0x42   : > { %467 = dma.hbm_to_vmem [thread:$0]  (!%p836_p11), %s182_s30, 128, %s185_s5, %s171_s6  }
  0x43   : > { %p920_p6 = scmp.ne.s32.totalorder %s915_s24, 0 }
  0x44   : > { %s847_s19 = sand.u32 (!%p920_p6), 1, %s683_s13   ;;  %p921_p8 = scmp.ne.s32.totalorder (!%p920_p6), %s913_s22, 0 }
  0x45   : > { %193 = sbr.rel (%p920_p6) target bundleno = 139 (0x8b), region = 32  ;;  %s434_s25 = sshll.u32 (!%p920_p6), %s847_s19, 3 }
  0x46   : > { %s196_s26 = scalar_lea.sflag (!%p920_p6), [#allocation3], %s847_s19  ;;  %s199_s28 = scalar_lea.vmem (!%p920_p6), [#allocation2], %s434_s25 }
  0x4a   : > { %666 = dma.done.wait (%p921_p8), %s196_s26, 128  }
  0x4b   : > { %668 = vsyncadd (%p921_p8), %s196_s26, 4294967168  ;;  %p922_p9 = scmp.ne.s32.totalorder %s911_s20, 0 }
  0x4d   : > { %670 = dma.done.wait (%p922_p9), [#allocation6], 128  }
  0x4e   : > { %672 = vsyncadd (%p922_p9), [#allocation6], 4294967168  ;;  %vm236_vm0 = vcmask 1043456   ;;  %v232_v0 = vld [vmem:[%s199_s28] sm:$0xff]  ;;  %v529_v49 = vld [vmem:[#allocation5] ss:$0 sps:$4 sm:$0xff]  }
  0x4f   : > { %v234_v1 = vcombine.high %v232_v0, %v232_v0  ;;  %v237_v2 = vsel %vm236_vm0, %v232_v0, 0.0  ;;  %v251_v3 = vmul.f32 %v232_v0, %v232_v0  ;;  %v530_v51 = vld [vmem:[#allocation7] ss:$0 sps:$4 sm:$0xff]   ;;  %s229_s20 = scalar_lea.vmem [#allocation8], %s434_s25  ;;  %s444_s24 = sshll.u32 %s691_s15, 7 }
  0x50   : > { %v238_v4 = vrot.slane %v237_v2, 4  ;;  %s321_s22 = sshll.u32 %s229_s20, 4  ;;  %s319_s4 = scalar_lea.hbm %s906_s3, %s444_s24  ;;  %s322_s22 = int_to_ptr.vmem [resolvable:$true] %s321_s22 }
  0x51   : > { %v244_v5 = vsel %vm236_vm0, %v234_v1, 0.0  ;;  %v253_v6 = vcombine.high %v251_v3, %v251_v3  ;;  %v255_v7 = vsel %vm236_vm0, %v251_v3, 0.0  ;;  %s305_s5 = scalar_lea.sflag [#allocation4], %s847_s19  ;;  %s615_s21 = scalar_lea.vmem %s322_s22, 128 }
  0x52   : > { %v239_v8 = vadd.f32 %v238_v4, %v237_v2  ;;  %v245_v9 = vrot.slane %v244_v5, 4  ;;  %v256_v10 = vrot.slane %v255_v7, 4  ;;  %p616_p3 = scmp.ne.s32.totalorder %s322_s22, %s615_s21  ;;  %s704_s6 = smov [#allocation8]  }
  0x53   : > { %v262_v11 = vsel %vm236_vm0, %v253_v6, 0.0  ;;  %s619_s7 = sshll.u32 %s704_s6, 4  ;;  %s620_s7 = int_to_ptr.vmem [resolvable:$false] %s619_s7 }
  0x54   : > { %v240_v12 = vrot.slane %v239_v8, 2  ;;  %v246_v13 = vadd.f32 %v245_v9, %v244_v5  ;;  %v257_v14 = vadd.f32 %v256_v10, %v255_v7  ;;  %v263_v15 = vrot.slane %v262_v11, 4  ;;  %p617_p11 = pnand %p616_p3, %p820_p12  ;;  %s621_s8 = scalar_lea.vmem %s620_s7, 256 }
  0x55   : > { %p622_p7 = scmp.lt.s32.totalorder %s322_s22, %s620_s7  ;;  %p623_p10 = scmp.lt.s32.totalorder %s621_s8, %s615_s21 }
  0x56   : > { %v241_v16 = vadd.f32 %v240_v12, %v239_v8  ;;  %v247_v17 = vrot.slane %v246_v13, 2  ;;  %v258_v18 = vrot.slane %v257_v14, 2  ;;  %v264_v19 = vadd.f32 %v263_v15, %v262_v11  ;;  %p618_p5 = pneg %p617_p11 }
  0x57   : > { %p624_p13 = por %p623_p10, %p622_p7 }
  0x58   : > { %v242_v20 = vrot.slane %v241_v16, 1  ;;  %v248_v21 = vadd.f32 %v247_v17, %v246_v13  ;;  %v259_v22 = vadd.f32 %v258_v18, %v257_v14  ;;  %v265_v23 = vrot.slane %v264_v19, 2 }
  0x59   : > { %p625_p0 = pnand %p624_p13, %p618_p5 }
  0x5a   : > { %v243_v24 = vadd.f32 %v242_v20, %v241_v16  ;;  %v249_v25 = vrot.slane %v248_v21, 1  ;;  %v260_v26 = vrot.slane %v259_v22, 1  ;;  %v266_v27 = vadd.f32 %v265_v23, %v264_v19 }
  0x5c   : > { %v250_v28 = vadd.f32 %v249_v25, %v248_v21  ;;  %v261_v29 = vadd.f32 %v260_v26, %v259_v22  ;;  %v267_v30 = vrot.slane %v266_v27, 1  ;;  %v269_v31 = vmul.f32 0.25, %v243_v24 }
  0x5e   : > { %v268_v32 = vadd.f32 %v267_v30, %v266_v27  ;;  %v270_v33 = vmul.f32 0.25, %v250_v28  ;;  %v271_v34 = vmul.f32 0.25, %v261_v29  ;;  %v273_v35 = vmul.f32 %v269_v31, %v269_v31 }
  0x60   : > { %v272_v36 = vmul.f32 0.25, %v268_v32  ;;  %v274_v37 = vmul.f32 %v270_v33, %v270_v33  ;;  %v275_v38 = vsub.f32 %v271_v34, %v273_v35  ;;  %v286_v44 = vcombine.low %v269_v31, %v270_v33 }
  0x62   : > { %v276_v39 = vsub.f32 %v272_v36, %v274_v37  ;;  %v277_v40 = vmax.f32 %v275_v38, 0.0  ;;  %v288_v46 = vsub.f32 %v232_v0, %v286_v44 }
  0x64   : > { %v278_v41 = vmax.f32 %v276_v39, 0.0  ;;  %v279_v42 = vadd.f32 1e-05, %v277_v40 }
  0x66   : > { %v280_v43 = vadd.f32 1e-05, %v278_v41  ;;  %531 = vrsqrt.f32 %v279_v42 }
  0x68   : > { %533 = vrsqrt.f32 %v280_v43 }
  0x73   : > { %v532_v45 = vpop.eup %531 }
  0x75   : > { %v534_v47 = vpop.eup %533 }
  0x76   : > { %v291_v48 = vcombine.low %v532_v45, %v534_v47 }
  0x78   : > { %v293_v50 = vmul.f32 %v291_v48, %v288_v46 }
  0x7a   : > { %v297_v52 = vmul.f32 %v529_v49, %v293_v50 }
  0x7c   : > { %v302_v53 = vadd.f32 %v530_v51, %v297_v52 }
  0x7e   : > { %303 = vst [vmem:[%s229_s20] sm:$0xff] %v302_v53 }
  0x7f   : > { %628 = shalt.err (!%p625_p0)
}
  0x80   : > { %s629_s15 = scalar_lea.hbm %s319_s4, 128  ;;  %s633_s19 = scalar_lea.hbm %s906_s3, 256 }
  0x81   : > { %p630_p1 = scmp.ne.s32.totalorder %s319_s4, %s629_s15  ;;  %p634_p6 = scmp.lt.s32.totalorder %s319_s4, %s906_s3 }
  0x82   : > { %p635_p8 = scmp.lt.s32.totalorder %s633_s19, %s629_s15 }
  0x83   : > { %p631_p2 = pnand %p630_p1, %p820_p12 }
  0x84   : > { %p636_p9 = por %p635_p8, %p634_p6 }
  0x85   : > { %p632_p4 = pneg %p631_p2 }
  0x87   : > { %p637_p3 = pnand %p636_p9, %p632_p4 }
  0x89   : > { %640 = shalt.err (!%p637_p3)
}
  0x8a   : > { %455 = dma.vmem_to_hbm [thread:$0]  (%p820_p12), %s322_s22, 128, %s319_s4, %s305_s5  }
  0x8b PF: > { %s333_s28 = sand.u32 1, %s679_s12   ;;  %p923_p11 = scmp.ne.s32.totalorder %s914_s23, 0 }
  0x8c   : > { %p924_p5 = scmp.ge.s32.totalorder %s699_s17, 2  ;;  %s334_s20 = scalar_lea.sflag [#allocation4], %s333_s28 }
  0x8e   : > { %p469_p7 = pnand %p924_p5, %p923_p11 }
  0x90   : > { %p470_p10 = pneg %p469_p7 }
  0x92   : > { %674 = dma.done.wait (%p470_p10), %s334_s20, 128  }
  0x93   : > { %676 = vsyncadd (%p470_p10), %s334_s20, 4294967168  ;;  %s20_s17 = sadd.s32 1, %s699_s17   ;;  %s925_s12 = smov %s683_s13 }
  0x94   : > { %p17_p13 = scmp.ge.s32.totalorder %s20_s17, 4   ;;  %s926_s13 = smov %s687_s14 }
  0x95   : > { %s927_s14 = smov %s829_s27  ;;  %s928_s15 = smov %s695_s16 }
  0x96   : > { %s929_s16 = smov %s931_s9  ;;  %19 = sbr.rel (!%p17_p13) target bundleno = 7 (0x7), region = 85 }
  0x9b   :  { %339 = vsyncpa [#allocation3], 1 }
  0x9c   :  { %341 = vsyncpa [#allocation3 + $0x1], 1 }
  0x9d   :  { %342 = vsyncpa [#allocation6], 1 }
  0x9e   :  { %343 = vsyncpa [#allocation4], 1 }
  0x9f   :  { %345 = vsyncpa [#allocation4 + $0x1], 1 }

</bundles_post_ra>
